<compile_context>
chip_gen: v5e
topology: v5e:2x2
jax: 0.10.0
libtpu: 0.0.40
codegen_flags: <defaults>
</compile_context>

<pallas_src>
import jax
import jax.numpy as jnp
import numpy as np
from jax import lax
from jax.experimental import pallas as pl
from jax.experimental.pallas import tpu as pltpu

# Above this many feature columns, gather the K selected columns wrapper-side
# instead of streaming the full rows against a dense scale vector.
_GATHER_THRESHOLD = 2048
# Per x input buffer budget (double-buffered by the pipeline).
_X_BUFFER_BYTES = 8 * 1024 * 1024
_VMEM_LIMIT_BYTES = 32 * 1024 * 1024


def _make_kernel(n_total, tn, need_col_mask):
    """Weighted row-sum kernel with an (optional) reduction axis over features."""

    def kernel(x_ref, scale_ref, bias_ref, o_ref, acc_ref):
        # x_ref:     [TB, TN] batch/feature tile of activations (input dtype)
        # scale_ref: [1,  TN] dense per-neuron scale (w/std at selected cols)
        # bias_ref:  [1]      scalar bias in SMEM
        # o_ref:     [TB, 1]  per-row weighted sums
        # acc_ref:   [TB, 1]  f32 VMEM accumulator (resident across k axis)
        k = pl.program_id(1)

        @pl.when(k == 0)
        def _init():
            acc_ref[...] = jnp.zeros_like(acc_ref)

        x = x_ref[...].astype(jnp.float32)          # cast in-register (bf16 -> f32)
        prod = x * scale_ref[...]
        if need_col_mask:
            # Last feature block extends past N: zero the garbage columns.
            col = lax.broadcasted_iota(jnp.int32, prod.shape, 1) + k * tn
            prod = jnp.where(col < n_total, prod, 0.0)
        acc_ref[...] += jnp.sum(prod, axis=1, keepdims=True)

        @pl.when(k == pl.num_programs(1) - 1)
        def _store():
            o_ref[...] = acc_ref[...] + bias_ref[0]

    return kernel


def _choose_tiles(batch, n_feat, itemsize):
    """Pick (TB, TN, grid_b, grid_n) sized by bytes, respecting (8,128) tiling."""
    sub = max(8, 32 // itemsize)           # sublane packing: f32->8, bf16->16, int8->32
    budget = _X_BUFFER_BYTES

    # Feature (lane) axis: keep full N when a `sub`-row strip of it fits the
    # budget, otherwise tile in multiples of 128 (innermost reduction axis).
    if n_feat <= 128 or sub * n_feat * itemsize <= budget:
        tn = n_feat
    else:
        tn = max(128, (budget // (sub * itemsize)) // 128 * 128)
        tn = min(tn, ((n_feat + 127) // 128) * 128)
    grid_n = -(-n_feat // tn)

    # Batch (sublane) axis: as many rows as fit the per-buffer budget.
    rows = max(sub, (budget // (tn * itemsize)) // sub * sub)
    b_pad = ((batch + sub - 1) // sub) * sub
    tb = min(rows, b_pad)
    grid_b = -(-batch // tb)

    # Give both v7x TensorCores work whenever the batch allows >= 2 tiles.
    if grid_b == 1 and b_pad >= 2 * sub:
        half = -(-batch // 2)
        tb = ((half + sub - 1) // sub) * sub
        grid_b = -(-batch // tb)

    return tb, tn, grid_b, grid_n


def _weighted_rowsum(x_mat, scale_vec, bias):
    """out[b] = sum_n x_mat[b, n] * scale_vec[n] + bias, via Pallas."""
    B, N = x_mat.shape
    itemsize = jnp.dtype(x_mat.dtype).itemsize
    TB, TN, grid_b, grid_n = _choose_tiles(B, N, itemsize)
    need_mask = (N % TN) != 0

    kernel = _make_kernel(N, TN, need_mask)

    out = pl.pallas_call(
        kernel,
        out_shape=jax.ShapeDtypeStruct((B, 1), jnp.float32),
        grid=(grid_b, grid_n),
        in_specs=[
            pl.BlockSpec((TB, TN), lambda i, k: (i, k)),              # x tile
            pl.BlockSpec((1, TN), lambda i, k: (0, k)),               # scale tile
            pl.BlockSpec(memory_space=pltpu.MemorySpace.SMEM),        # scalar bias
        ],
        out_specs=pl.BlockSpec((TB, 1), lambda i, k: (i, 0)),
        scratch_shapes=[pltpu.VMEM((TB, 1), jnp.float32)],
        compiler_params=pltpu.CompilerParams(
            dimension_semantics=("parallel", "arbitrary"),
            vmem_limit_bytes=_VMEM_LIMIT_BYTES,
        ),
        cost_estimate=pl.CostEstimate(
            flops=2 * B * N,
            bytes_accessed=B * N * itemsize + N * 4 + B * 4,
            transcendentals=0,
        ),
    )(x_mat, scale_vec.reshape(1, N), bias.reshape(1))

    return out.reshape(-1)


@jax.jit
def top10_corr_neurons(x_neuron, corrs_top_10, top10_mean, top10_std, corrs_top_10_vals):
    """JAX/Pallas equivalent of Top10CorrNeurons.forward.

    x_neuron:          [B, N] float (f32/bf16)
    corrs_top_10:      [K]    int32 column indices
    top10_mean/std:    [K]    float
    corrs_top_10_vals: [K]    float (un-normalized; normalized here, as in __init__)
    returns:           [B]    float32
    """
    B, N = x_neuron.shape

    # Constant folding (O(K)+O(N) work, outside the streaming pass).
    vals = corrs_top_10_vals.astype(jnp.float32)
    w = vals / jnp.sum(vals)
    coef = w / top10_std.astype(jnp.float32)          # matches torch: no eps guard
    bias = -jnp.sum(coef * top10_mean.astype(jnp.float32))

    if N > _GATHER_THRESHOLD:
        # Large N: gather the K columns once (B*K bytes) instead of streaming B*N.
        x_mat = jnp.take(x_neuron, corrs_top_10, axis=1)
        scale = coef
    else:
        # Small/medium N: one streaming pass over X against a dense scale vector.
        # .add (not .set) matches PyTorch semantics for duplicate indices.
        x_mat = x_neuron
        scale = jnp.zeros((N,), jnp.float32).at[corrs_top_10].add(coef)

    return _weighted_rowsum(x_mat, scale, bias)


def _reference(x_neuron, corrs_top_10, top10_mean, top10_std, corrs_top_10_vals):
    # Direct transcription of the PyTorch forward.
    w = corrs_top_10_vals / jnp.sum(corrs_top_10_vals)
    xn = (x_neuron[:, corrs_top_10] - top10_mean) / top10_std
    return jnp.sum(xn * w, axis=1)


if __name__ == "__main__":
    key = jax.random.PRNGKey(0)
    k_x, k_idx, k_mean, k_std, k_vals = jax.random.split(key, 5)

    B, N, K = 8, 32, 10

    # Deterministic synthetic inputs (module __init__ params + forward input).
    x_neuron = jax.random.normal(k_x, (B, N), dtype=jnp.float32)
    corrs_top_10 = jax.random.permutation(k_idx, jnp.arange(N, dtype=jnp.int32))[:K]
    top10_mean = jax.random.normal(k_mean, (K,), dtype=jnp.float32)
    top10_std = jax.random.uniform(k_std, (K,), dtype=jnp.float32, minval=0.5, maxval=2.0)
    corrs_top_10_vals = jax.random.uniform(k_vals, (K,), dtype=jnp.float32, minval=0.1, maxval=1.0)

    out = top10_corr_neurons(x_neuron, corrs_top_10, top10_mean, top10_std, corrs_top_10_vals)
    out = jax.block_until_ready(out)

    ref = _reference(x_neuron, corrs_top_10, top10_mean, top10_std, corrs_top_10_vals)
    np.testing.assert_allclose(np.asarray(out), np.asarray(ref), rtol=1e-4, atol=1e-5)

    print("KERNEL_OK")
</pallas_src>

<mosaic_0001>
module attributes {stable_mosaic.version = 11 : i64} {
  func.func @kernel(%arg0: i32, %arg1: i32, %arg2: memref<8x32xf32, #tpu.memory_space<vmem>>, %arg3: memref<1x32xf32, #tpu.memory_space<vmem>>, %arg4: memref<1xf32, #tpu.memory_space<smem>>, %arg5: memref<8x1xf32, #tpu.memory_space<vmem>>, %arg6: memref<8x1xf32, #tpu.memory_space<vmem>>) attributes {dimension_semantics = [#tpu.dimension_semantics<parallel>, #tpu.dimension_semantics<arbitrary>], iteration_bounds = array<i64: 1, 1>, scalar_prefetch = 0 : i64, scratch_operands = 1 : i64, tpu.core_type = #tpu.core_type<tc>, window_params = [{transform_indices = @transform_0, window_bounds = array<i64: 8, 32>}, {transform_indices = @transform_1, window_bounds = array<i64: 1, 32>}, {transform_indices = @transform_2, window_bounds = array<i64: 1>}, {transform_indices = @transform_3, window_bounds = array<i64: 8, 1>}]} {
    %c0_i32 = arith.constant 0 : i32
    %0 = arith.cmpi eq, %arg1, %c0_i32 : i32
    %1 = arith.extui %0 : i1 to i32
    %c0_i32_0 = arith.constant 0 : i32
    %2 = arith.cmpi ne, %1, %c0_i32_0 : i32
    scf.if %2 {
      %cst_10 = arith.constant 0.000000e+00 : f32
      %15 = vector.broadcast %cst_10 : f32 to vector<8x1xf32>
      %c0_11 = arith.constant 0 : index
      %c0_12 = arith.constant 0 : index
      %16 = vector.load %arg6[%c0_11, %c0_12] : memref<8x1xf32, #tpu.memory_space<vmem>>, vector<8x1xf32>
      tpu.vector_store %arg6[%c0_11, %c0_12], %15 {strides = array<i32>} : memref<8x1xf32, #tpu.memory_space<vmem>>, vector<8x1xf32>,
    } else {
    }
    %c0 = arith.constant 0 : index
    %c0_1 = arith.constant 0 : index
    %3 = vector.load %arg2[%c0, %c0_1] : memref<8x32xf32, #tpu.memory_space<vmem>>, vector<8x32xf32>
    %c0_2 = arith.constant 0 : index
    %c0_3 = arith.constant 0 : index
    %4 = vector.load %arg3[%c0_2, %c0_3] : memref<1x32xf32, #tpu.memory_space<vmem>>, vector<1x32xf32>
    %5 = vector.broadcast %4 : vector<1x32xf32> to vector<8x32xf32>
    %6 = arith.mulf %3, %5 : vector<8x32xf32>
    %c0_4 = arith.constant 0 : index
    %c0_5 = arith.constant 0 : index
    %7 = vector.load %arg6[%c0_4, %c0_5] : memref<8x1xf32, #tpu.memory_space<vmem>>, vector<8x1xf32>
    %cst = arith.constant dense<0.000000e+00> : vector<8xf32>
    %8 = vector.multi_reduction <add>, %6, %cst [1] : vector<8x32xf32> to vector<8xf32>
    %9 = vector.shape_cast %8 : vector<8xf32> to vector<8x1xf32>
    %10 = arith.addf %7, %9 : vector<8x1xf32>
    %c0_6 = arith.constant 0 : index
    %c0_7 = arith.constant 0 : index
    %11 = vector.load %arg6[%c0_6, %c0_7] : memref<8x1xf32, #tpu.memory_space<vmem>>, vector<8x1xf32>
    tpu.vector_store %arg6[%c0_6, %c0_7], %10 {strides = array<i32>} : memref<8x1xf32, #tpu.memory_space<vmem>>, vector<8x1xf32>,
    %c0_i32_8 = arith.constant 0 : i32
    %12 = arith.cmpi eq, %arg1, %c0_i32_8 : i32
    %13 = arith.extui %12 : i1 to i32
    %c0_i32_9 = arith.constant 0 : i32
    %14 = arith.cmpi ne, %13, %c0_i32_9 : i32
    scf.if %14 {
      %c0_10 = arith.constant 0 : index
      %c0_11 = arith.constant 0 : index
      %15 = vector.load %arg6[%c0_10, %c0_11] : memref<8x1xf32, #tpu.memory_space<vmem>>, vector<8x1xf32>
      %c0_12 = arith.constant 0 : index
      %16 = memref.load %arg4[%c0_12] : memref<1xf32, #tpu.memory_space<smem>>
      %17 = vector.broadcast %16 : f32 to vector<8x1xf32>
      %18 = arith.addf %15, %17 : vector<8x1xf32>
      %c0_13 = arith.constant 0 : index
      %c0_14 = arith.constant 0 : index
      %19 = vector.load %arg5[%c0_13, %c0_14] : memref<8x1xf32, #tpu.memory_space<vmem>>, vector<8x1xf32>
      tpu.vector_store %arg5[%c0_13, %c0_14], %18 {strides = array<i32>} : memref<8x1xf32, #tpu.memory_space<vmem>>, vector<8x1xf32>,
    } else {
    }
    return
  }
  func.func @transform_0(%arg0: i32, %arg1: i32) -> (i32, i32) {
    %c0_i32 = arith.constant 0 : i32
    return %arg0, %arg1 : i32, i32
  }
  func.func @transform_1(%arg0: i32, %arg1: i32) -> (i32, i32) {
    %c0_i32 = arith.constant 0 : i32
    %c0_i32_0 = arith.constant 0 : i32
    return %c0_i32, %arg1 : i32, i32
  }
  func.func @transform_2(%arg0: i32, %arg1: i32) -> i32 {
    %c0_i32 = arith.constant 0 : i32
    %c0_i32_0 = arith.constant 0 : i32
    return %c0_i32 : i32
  }
  func.func @transform_3(%arg0: i32, %arg1: i32) -> (i32, i32) {
    %c0_i32 = arith.constant 0 : i32
    %c0_i32_0 = arith.constant 0 : i32
    return %arg0, %c0_i32 : i32, i32
  }
}

</mosaic_0001>

<bundles_post_ra>
// kernel: top10_corr_neurons.1
= control target key start
LH: loop header
LB: loop body
LE: loop exit
PB: predicated region body
PF: predicated region fallthrough
CT: control target
= control target key end

     0   :  { %vm19_vm0 = vcmask 7168   ;;  %v49_v2 = vmov 0.0   ;;  %vm28_vm1 = vcmask 261120   ;;  %s85_s0 = inlined_call_operand.vmem [shape: f32[8,32], index: 0, kind: input, shape index: {}]   ;;  %s86_s1 = inlined_call_operand.vmem [shape: f32[1,32], index: 1, kind: input, shape index: {}]   ;;  %s87_s2 = inlined_call_operand.<no memory space> [shape: f32[1], index: 2, kind: input, shape index: {}]   ;;  %s88_s3 = inlined_call_operand.vmem [shape: f32[8,1], index: 3, kind: output, shape index: {}]  }
   0x1   :  { %v21_v0 = vld [vmem:[%s85_s0] sm:$0xff]  ;;  %20 = vst.msk [vmem:[#allocation2] sm:$0xff] %vm19_vm0, %v49_v2  ;;  %v40_v8 = vstv %s87_s2 }
   0x2   :  { %v48_v1 = vld [vmem:[%s86_s1] ss:$0 sm:$0xff] }
   0x3   :  { %v26_v3 = vmul.f32 %v48_v1, %v21_v0 }
   0x5   :  { %v29_v4 = vsel %vm28_vm1, %v26_v3, 0.0 }
   0x6   :  { %30 = vadd.xlane.f32.xlu0 %v29_v4 }
   0x8   :  { %v27_v5 = vld [vmem:[#allocation2] sm:$0xff] }
  0x79   :  { %v31_v6 = vpop.xlane.xlu0 %30 }
  0x7a   :  { %v32_v7 = vadd.f32 %v31_v6, %v27_v5 }
  0x7c   :  { %34 = vst.msk [vmem:[#allocation2] sm:$0xff] %vm19_vm0, %v32_v7 }
  0x83   :  { %v38_v9 = vld [vmem:[#allocation2] sm:$0xff] }
  0x84   :  { %v41_v10 = vadd.f32 %v40_v8, %v38_v9 }
  0x86   :  { %42 = vst.msk [vmem:[%s88_s3] sm:$0xff] %vm19_vm0, %v41_v10 }

</bundles_post_ra>
